<compile_context>
chip_gen: v7x
topology: tpu7x:2x2x1
jax: 0.10.0
libtpu: 0.0.40
codegen_flags: <defaults>
</compile_context>

<pallas_src>
import jax
import jax.numpy as jnp
from jax.experimental import pallas as pl
from jax.experimental.pallas import tpu as pltpu


def _ffn_kernel(x_ref, w1_ref, b1_ref, w2_ref, b2_ref, o_ref, *scratch):
    # x_ref:  [TM, d_model]     w1_ref: [d_model, TFF]   b1_ref: [1, TFF]
    # w2_ref: [TFF, d_model]    b2_ref: [1, d_model]     o_ref:  [TM, d_model]
    # scratch: optional f32 [TM, d_model] accumulator (only for non-f32 output)
    acc_ref = scratch[0] if scratch else o_ref
    k = pl.program_id(1)

    @pl.when(k == 0)
    def _():
        acc_ref[...] = jnp.zeros_like(acc_ref)

    # First matmul on this d_ff slab; accumulate in f32 on the MXU.
    h = jnp.dot(x_ref[...], w1_ref[...], preferred_element_type=jnp.float32)
    h = jnp.maximum(h + b1_ref[...], 0.0)          # bias + ReLU on the VPU (f32)
    # Dropout: identity in eval mode.
    # TODO(synk): training-mode dropout via pltpu.prng_seed / prng_random_bits.

    # Second matmul: this d_ff slab's partial contribution to the output.
    h = h.astype(w2_ref.dtype)                     # single downcast at MXU boundary
    acc_ref[...] += jnp.dot(h, w2_ref[...], preferred_element_type=jnp.float32)

    @pl.when(k == pl.num_programs(1) - 1)
    def _():
        # For d_model >= 128 this is a lane-dense store (unmasked vst).
        o_ref[...] = (acc_ref[...] + b2_ref[...]).astype(o_ref.dtype)


def _round_up(x, m):
    return ((x + m - 1) // m) * m


def _largest_aligned_divisor(dim, preferred, align):
    """Largest t <= preferred with t % align == 0 and dim % t == 0, else dim."""
    if dim <= preferred:
        return dim
    t = (preferred // align) * align
    while t >= align:
        if dim % t == 0:
            return t
        t -= align
    return dim


def _vmem_bytes(tm, tff, d_model, in_sz, w_sz, out_sz, need_scratch):
    est = 2 * tm * d_model * in_sz            # x tile (double-buffered)
    est += 2 * d_model * tff * w_sz           # W1 column slab
    est += 2 * tff * 4                        # b1 slice
    est += 2 * tff * d_model * w_sz           # W2 row slab
    est += 2 * d_model * 4                    # b2
    est += 2 * tm * d_model * out_sz          # out tile
    est += tm * tff * 4                       # f32 intermediate h (compiler temp)
    if need_scratch:
        est += tm * d_model * 4               # f32 accumulator scratch
    return est


def feed_forward(x, w1, b1, w2, b2, *, tile_m=1024, tile_ff=None,
                 compute_dtype=None):
    """x: [B, S, d_model] -> [B, S, d_model];  y = relu(x @ W1 + b1) @ W2 + b2."""
    B, S, d_model = x.shape
    d_ff = w1.shape[1]
    M = B * S
    out_dtype = x.dtype

    x2d = x.reshape(M, d_model)
    if compute_dtype is not None:
        # Cast operands once in HBM: halves weight/activation DMA traffic and
        # feeds the native bf16 MXU; accumulation stays f32 in the kernel.
        x2d = x2d.astype(compute_dtype)
        w1 = w1.astype(compute_dtype)
        w2 = w2.astype(compute_dtype)
    b1_2d = b1.reshape(1, d_ff)
    b2_2d = b2.reshape(1, d_model)

    need_scratch = jnp.dtype(out_dtype) != jnp.dtype(jnp.float32)
    in_sz = x2d.dtype.itemsize
    w_sz = w1.dtype.itemsize
    out_sz = jnp.dtype(out_dtype).itemsize

    # ---- VMEM budget: physical capacity minus headroom (v7x: 64 MiB per TC).
    try:
        vmem_cap = int(pltpu.get_tpu_info().vmem_capacity_bytes)
    except Exception:  # pragma: no cover - conservative fallback
        vmem_cap = 64 * 1024 * 1024
    budget = int(vmem_cap * 0.85)

    # ---- Row tile: large for arithmetic intensity, but always >= 2 row tiles
    # when possible so the "parallel" axis shards across v7x's 2 TensorCores.
    if M <= 8:
        tm = M
    elif M <= tile_m:
        tm = _round_up(pl.cdiv(M, 2), 8)
    elif M <= 2 * tile_m:
        tm = _round_up(pl.cdiv(M, 2), 256)
    else:
        tm = tile_m

    # ---- d_ff tile: prefer full residency (weights DMA'd exactly once),
    # otherwise largest 128-aligned divisor of d_ff that fits the budget.
    def pick_tff(tm_):
        if tile_ff is not None:
            return _largest_aligned_divisor(d_ff, tile_ff, 128)
        if _vmem_bytes(tm_, d_ff, d_model, in_sz, w_sz, out_sz,
                       need_scratch) <= budget:
            return d_ff
        t = (min(d_ff, 4096) // 128) * 128
        while t >= 128:
            if d_ff % t == 0 and _vmem_bytes(tm_, t, d_model, in_sz, w_sz,
                                             out_sz, need_scratch) <= budget:
                return t
            t -= 128
        return 128 if d_ff % 128 == 0 else d_ff

    tff = pick_tff(tm)
    # If even the smallest slab does not fit, shrink the row tile.
    while (_vmem_bytes(tm, tff, d_model, in_sz, w_sz, out_sz, need_scratch)
           > budget and tm > 8):
        tm = max(8, _round_up(tm // 2, 8))
        tff = pick_tff(tm)

    grid = (pl.cdiv(M, tm), pl.cdiv(d_ff, tff))
    num_row_tiles, k_steps = grid

    est = _vmem_bytes(tm, tff, d_model, in_sz, w_sz, out_sz, need_scratch)
    vmem_limit = int(min(max(est + (4 << 20), 32 << 20), int(vmem_cap * 0.9)))

    # Advisory cost: weights re-stream once per row tile unless fully resident.
    weight_passes = 1 if k_steps == 1 else num_row_tiles
    cost = pl.CostEstimate(
        flops=4 * M * d_model * d_ff,            # two matmuls, 2 flops/MAC
        transcendentals=0,
        bytes_accessed=int(in_sz * M * d_model + out_sz * M * d_model
                           + weight_passes * w_sz * 2 * d_model * d_ff
                           + b1_2d.dtype.itemsize * d_ff
                           + b2_2d.dtype.itemsize * d_model),
    )

    scratch_shapes = ([pltpu.VMEM((tm, d_model), jnp.float32)]
                      if need_scratch else [])

    out2d = pl.pallas_call(
        _ffn_kernel,
        out_shape=jax.ShapeDtypeStruct((M, d_model), out_dtype),
        grid_spec=pltpu.PrefetchScalarGridSpec(
            num_scalar_prefetch=0,
            grid=grid,
            in_specs=[
                pl.BlockSpec((tm, d_model), lambda i, k: (i, 0)),   # x (resident across k)
                pl.BlockSpec((d_model, tff), lambda i, k: (0, k)),  # W1 column slab
                pl.BlockSpec((1, tff), lambda i, k: (0, k)),        # b1 slice
                pl.BlockSpec((tff, d_model), lambda i, k: (k, 0)),  # W2 row slab
                pl.BlockSpec((1, d_model), lambda i, k: (0, 0)),    # b2 (constant)
            ],
            out_specs=pl.BlockSpec((tm, d_model), lambda i, k: (i, 0)),
            scratch_shapes=scratch_shapes,
        ),
        compiler_params=pltpu.CompilerParams(
            dimension_semantics=("parallel", "arbitrary"),
            vmem_limit_bytes=vmem_limit,
        ),
        cost_estimate=cost,
    )(x2d, w1, b1_2d, w2, b2_2d)

    return out2d.reshape(B, S, d_model)


if __name__ == "__main__":
    # Small shapes consistent with the module: d_model=32, d_ff=64, batch=2, seq=8.
    B, S, d_model, d_ff = 2, 8, 32, 64

    key = jax.random.PRNGKey(0)
    kx, kw1, kb1, kw2, kb2 = jax.random.split(key, 5)

    x = jax.random.normal(kx, (B, S, d_model), dtype=jnp.float32)
    # Deterministic "nn.Linear"-style params (stored transposed for the kernel).
    w1 = jax.random.normal(kw1, (d_model, d_ff), dtype=jnp.float32) / jnp.sqrt(d_model)
    b1 = jax.random.normal(kb1, (d_ff,), dtype=jnp.float32) * 0.01
    w2 = jax.random.normal(kw2, (d_ff, d_model), dtype=jnp.float32) / jnp.sqrt(d_ff)
    b2 = jax.random.normal(kb2, (d_model,), dtype=jnp.float32) * 0.01

    # f32 path (exact vs. the PyTorch reference).  On v5e/v6e/v7x production
    # shapes, pass compute_dtype=jnp.bfloat16 for the fast bf16 MXU path.
    out = jax.block_until_ready(feed_forward(x, w1, b1, w2, b2))

    # Pure-JAX reference check (eval-mode dropout = identity).
    ref = (jnp.maximum(x.reshape(-1, d_model) @ w1 + b1, 0.0) @ w2 + b2
           ).reshape(B, S, d_model)
    assert out.shape == (B, S, d_model)
    assert jnp.allclose(out, ref, atol=1e-4, rtol=1e-4)

    print("KERNEL_OK")
</pallas_src>

<mosaic_0001>
module attributes {stable_mosaic.version = 11 : i64} {
  func.func @_ffn_kernel(%arg0: i32, %arg1: i32, %arg2: memref<8x32xf32, #tpu.memory_space<vmem>>, %arg3: memref<32x64xf32, #tpu.memory_space<vmem>>, %arg4: memref<1x64xf32, #tpu.memory_space<vmem>>, %arg5: memref<64x32xf32, #tpu.memory_space<vmem>>, %arg6: memref<1x32xf32, #tpu.memory_space<vmem>>, %arg7: memref<8x32xf32, #tpu.memory_space<vmem>>) attributes {dimension_semantics = [#tpu.dimension_semantics<parallel>, #tpu.dimension_semantics<arbitrary>], iteration_bounds = array<i64: 2, 1>, scalar_prefetch = 0 : i64, scratch_operands = 0 : i64, tpu.core_type = #tpu.core_type<tc>, window_params = [{transform_indices = @transform_0, window_bounds = array<i64: 8, 32>}, {transform_indices = @transform_1, window_bounds = array<i64: 32, 64>}, {transform_indices = @transform_2, window_bounds = array<i64: 1, 64>}, {transform_indices = @transform_3, window_bounds = array<i64: 64, 32>}, {pipeline_mode = #tpu.pipeline_mode<synchronous>, transform_indices = @transform_4, window_bounds = array<i64: 1, 32>}, {transform_indices = @transform_5, window_bounds = array<i64: 8, 32>}]} {
    %c0_i32 = arith.constant 0 : i32
    %0 = arith.cmpi eq, %arg1, %c0_i32 : i32
    %1 = arith.extui %0 : i1 to i32
    %c0_i32_0 = arith.constant 0 : i32
    %2 = arith.cmpi ne, %1, %c0_i32_0 : i32
    scf.if %2 {
      %cst_16 = arith.constant 0.000000e+00 : f32
      %19 = vector.broadcast %cst_16 : f32 to vector<8x32xf32>
      %c0_17 = arith.constant 0 : index
      %c0_18 = arith.constant 0 : index
      %20 = vector.load %arg7[%c0_17, %c0_18] : memref<8x32xf32, #tpu.memory_space<vmem>>, vector<8x32xf32>
      tpu.vector_store %arg7[%c0_17, %c0_18], %19 {strides = array<i32>} : memref<8x32xf32, #tpu.memory_space<vmem>>, vector<8x32xf32>,
    } else {
    }
    %c0 = arith.constant 0 : index
    %c0_1 = arith.constant 0 : index
    %3 = vector.load %arg2[%c0, %c0_1] : memref<8x32xf32, #tpu.memory_space<vmem>>, vector<8x32xf32>
    %c0_2 = arith.constant 0 : index
    %c0_3 = arith.constant 0 : index
    %4 = vector.load %arg3[%c0_2, %c0_3] : memref<32x64xf32, #tpu.memory_space<vmem>>, vector<32x64xf32>
    %cst = arith.constant dense<0.000000e+00> : vector<8x64xf32>
    %5 = tpu.matmul %3, %4, %cst {dimension_numbers = #tpu.dot_dimension_numbers<[1], [0], [0], [1], [0, 0, 1, 1], [], []>} : vector<8x32xf32>, vector<32x64xf32>, vector<8x64xf32> -> vector<8x64xf32>
    %c0_4 = arith.constant 0 : index
    %c0_5 = arith.constant 0 : index
    %6 = vector.load %arg4[%c0_4, %c0_5] : memref<1x64xf32, #tpu.memory_space<vmem>>, vector<1x64xf32>
    %7 = vector.broadcast %6 : vector<1x64xf32> to vector<8x64xf32>
    %8 = arith.addf %5, %7 : vector<8x64xf32>
    %cst_6 = arith.constant 0.000000e+00 : f32
    %9 = vector.broadcast %cst_6 : f32 to vector<8x64xf32>
    %10 = arith.maximumf %8, %9 : vector<8x64xf32>
    %c0_7 = arith.constant 0 : index
    %c0_8 = arith.constant 0 : index
    %11 = vector.load %arg7[%c0_7, %c0_8] : memref<8x32xf32, #tpu.memory_space<vmem>>, vector<8x32xf32>
    %c0_9 = arith.constant 0 : index
    %c0_10 = arith.constant 0 : index
    %12 = vector.load %arg5[%c0_9, %c0_10] : memref<64x32xf32, #tpu.memory_space<vmem>>, vector<64x32xf32>
    %cst_11 = arith.constant dense<0.000000e+00> : vector<8x32xf32>
    %13 = tpu.matmul %10, %12, %cst_11 {dimension_numbers = #tpu.dot_dimension_numbers<[1], [0], [0], [1], [0, 0, 1, 1], [], []>} : vector<8x64xf32>, vector<64x32xf32>, vector<8x32xf32> -> vector<8x32xf32>
    %14 = arith.addf %11, %13 : vector<8x32xf32>
    %c0_12 = arith.constant 0 : index
    %c0_13 = arith.constant 0 : index
    %15 = vector.load %arg7[%c0_12, %c0_13] : memref<8x32xf32, #tpu.memory_space<vmem>>, vector<8x32xf32>
    tpu.vector_store %arg7[%c0_12, %c0_13], %14 {strides = array<i32>} : memref<8x32xf32, #tpu.memory_space<vmem>>, vector<8x32xf32>,
    %c0_i32_14 = arith.constant 0 : i32
    %16 = arith.cmpi eq, %arg1, %c0_i32_14 : i32
    %17 = arith.extui %16 : i1 to i32
    %c0_i32_15 = arith.constant 0 : i32
    %18 = arith.cmpi ne, %17, %c0_i32_15 : i32
    scf.if %18 {
      %c0_16 = arith.constant 0 : index
      %c0_17 = arith.constant 0 : index
      %19 = vector.load %arg7[%c0_16, %c0_17] : memref<8x32xf32, #tpu.memory_space<vmem>>, vector<8x32xf32>
      %c0_18 = arith.constant 0 : index
      %c0_19 = arith.constant 0 : index
      %20 = vector.load %arg6[%c0_18, %c0_19] : memref<1x32xf32, #tpu.memory_space<vmem>>, vector<1x32xf32>
      %21 = vector.broadcast %20 : vector<1x32xf32> to vector<8x32xf32>
      %22 = arith.addf %19, %21 : vector<8x32xf32>
      %c0_20 = arith.constant 0 : index
      %c0_21 = arith.constant 0 : index
      %23 = vector.load %arg7[%c0_20, %c0_21] : memref<8x32xf32, #tpu.memory_space<vmem>>, vector<8x32xf32>
      tpu.vector_store %arg7[%c0_20, %c0_21], %22 {strides = array<i32>} : memref<8x32xf32, #tpu.memory_space<vmem>>, vector<8x32xf32>,
    } else {
    }
    return
  }
  func.func @transform_0(%arg0: i32, %arg1: i32) -> (i32, i32) {
    %c0_i32 = arith.constant 0 : i32
    %c0_i32_0 = arith.constant 0 : i32
    return %arg0, %c0_i32 : i32, i32
  }
  func.func @transform_1(%arg0: i32, %arg1: i32) -> (i32, i32) {
    %c0_i32 = arith.constant 0 : i32
    %c0_i32_0 = arith.constant 0 : i32
    return %c0_i32, %arg1 : i32, i32
  }
  func.func @transform_2(%arg0: i32, %arg1: i32) -> (i32, i32) {
    %c0_i32 = arith.constant 0 : i32
    %c0_i32_0 = arith.constant 0 : i32
    return %c0_i32, %arg1 : i32, i32
  }
  func.func @transform_3(%arg0: i32, %arg1: i32) -> (i32, i32) {
    %c0_i32 = arith.constant 0 : i32
    %c0_i32_0 = arith.constant 0 : i32
    return %arg1, %c0_i32 : i32, i32
  }
  func.func @transform_4(%arg0: i32, %arg1: i32) -> (i32, i32) {
    %c0_i32 = arith.constant 0 : i32
    %c0_i32_0 = arith.constant 0 : i32
    %c0_i32_1 = arith.constant 0 : i32
    return %c0_i32, %c0_i32_0 : i32, i32
  }
  func.func @transform_5(%arg0: i32, %arg1: i32) -> (i32, i32) {
    %c0_i32 = arith.constant 0 : i32
    %c0_i32_0 = arith.constant 0 : i32
    return %arg0, %c0_i32 : i32, i32
  }
}

</mosaic_0001>

<bundles_post_ra>
// kernel: tpu_custom_call.1
= control target key start
LH: loop header
LB: loop body
LE: loop exit
PB: predicated region body
PF: predicated region fallthrough
CT: control target
= control target key end

     0   :  { %10 = vsyncpa [#allocation3], 0  ;;  %s1021_s0 = inlined_call_operand.vmem [shape: f32[16,32], index: 0, kind: input, shape index: {}]   ;;  %s1022_s1 = inlined_call_operand.vmem [shape: f32[32,64], index: 1, kind: input, shape index: {}]   ;;  %s1023_s2 = inlined_call_operand.vmem [shape: f32[1,64], index: 2, kind: input, shape index: {}]   ;;  %s1024_s3 = inlined_call_operand.vmem [shape: f32[64,32], index: 3, kind: input, shape index: {}]   ;;  %s1025_s4 = inlined_call_operand.vmem [shape: f32[1,32], index: 4, kind: input, shape index: {}]   ;;  %s1026_s5 = inlined_call_operand.hbm [shape: f32[16,32], index: 5, kind: output, shape index: {}]  }
   0x1   :  { %12 = vsyncpa [#allocation3 + $0x1], 0  ;;  %s851_s18 = smov 0   ;;  %s853_s19 = smov 0  }
   0x2   :  { %s855_s20 = smov 0   ;;  %s857_s21 = smov 0  }
   0x3   :  { %s859_s22 = smov 0   ;;  %s861_s23 = smov 0  }
   0x4 LB: > { %s599_s24 = sadd.s32 4294967295, %s815_s23   ;;  %s600_s25 = sadd.s32 4294967294, %s815_s23   ;;  %s815_s23 = sphi %s861_s23, %s18_s23   ;;  %s811_s22 = sphi %s859_s22, %s1033_s22   ;;  %s807_s21 = sphi %s857_s21, %s1032_s21   ;;  %s803_s20 = sphi %s855_s20, %s1031_s20   ;;  %s799_s19 = sphi %s853_s19, %s1030_s19   ;;  %s795_s18 = sphi %s851_s18, %s1029_s18  }
   0x5   : > { %s30_s26 = sadd.s32 1, %s811_s22  ;;  %s162_s27 = sadd.s32 1, %s803_s20 }
   0x6   : > { %p32_p0 = scmp.ge.s32.totalorder %s30_s26, 2  ;;  %p172_p1 = scmp.ne.s32.totalorder %s803_s20, %s799_s19 }
   0x7   : > { %p173_p2 = scmp.eq.s32.totalorder %s599_s24, 1  ;;  %p178_p3 = scmp.ne.s32.totalorder %s799_s19, %s795_s18 }
   0x8   : > { %s1035_s26 = smov (%p32_p0, %s30_s26), 0  ;;  %p179_p5 = scmp.eq.s32.totalorder %s600_s25, 1 }
   0x9   : > { %p891_p4 = por %p173_p2, %p172_p1  ;;  %s159_s29 = ssub.s32 %s811_s22, %s1035_s26 }
   0xa   : > { %p606_p6 = scmp.ge.s32.totalorder %s815_s23, 1  ;;  %p160_p7 = scmp.eq.s32.totalorder %s159_s29, 0 }
   0xb   : > { %p898_p8 = por %p179_p5, %p178_p3  ;;  %p229_p9 = scmp.lt.s32.totalorder %s815_s23, 3 }
   0xc   : > { %s904_s6 = scalar_select %p160_p7, %s803_s20, %s162_s27  }
   0xd   : > { %p230_p10 = pnand %p606_p6, %p229_p9 }
   0xe   : > { %v292_v0 = vld [vmem:[%s1022_s1] sm:$0xff] (!%p230_p10)  ;;  %v293_v1 = vld [vmem:[%s1022_s1 + $0x8] sm:$0xff] (!%p230_p10)  ;;  %v294_v2 = vld [vmem:[%s1022_s1 + $0x10] sm:$0xff] (!%p230_p10)  ;;  %v817_v3 = vmov (!%p230_p10), 0.0|0.0   ;;  %vm818_vm0 = vmmov (!%p230_p10), 0   ;;  %v819_v6 = vmov (!%p230_p10), 0.0  }
   0xf   : > { %233 = sbr.rel (%p230_p10) target bundleno = 481 (0x1e1), region = 40  ;;  %661 = vmatprep.subr.bf16.mxu0 (!%p230_p10), %v817_v3  ;;  %v662_v4 = vpack.c.bf16 (!%p230_p10), %v293_v1, %v292_v0  ;;  %v295_v5 = vld [vmem:[%s1022_s1 + $0x18] sm:$0xff] (!%p230_p10)  ;;  %639 = vmatprep.mubr.msk.f32.mxu0 (!%p230_p10), %vm818_vm0, %v819_v6  ;;  %s265_s15 = sand.u32 (!%p230_p10), 1, %s799_s19   ;;  %v379_v7 = vld [vmem:[%s1024_s3] sm:$0xff] (!%p230_p10)  ;;  %v380_v8 = vld [vmem:[%s1024_s3 + $0x8] sm:$0xff] (!%p230_p10)  ;;  %vm289_vm1 = vcmask (!%p230_p10), 261120  }
  0x10   : > { %p268_p11 = scmp.lt.s32.totalorder (!%p230_p10), %s807_s21, 1  ;;  %s607_s27 = sshll.u32 (!%p230_p10), %s265_s15, 3  ;;  %667 = vmatprep.subr.bf16.mxu1 (!%p230_p10), %v817_v3  ;;  %v668_v9 = vpack.c.bf16 (!%p230_p10), %v380_v8, %v379_v7  ;;  %v381_v10 = vld [vmem:[%s1024_s3 + $0x10] sm:$0xff] (!%p230_p10)  ;;  %v382_v11 = vld [vmem:[%s1024_s3 + $0x18] sm:$0xff] (!%p230_p10)  ;;  %658 = vmatprep.mubr.msk.f32.mxu1 (!%p230_p10), %vm818_vm0, %v819_v6  ;;  %v665_v12 = vpack.c.bf16 (!%p230_p10), %v295_v5, %v294_v2  ;;  %v383_v14 = vld [vmem:[%s1024_s3 + $0x20] sm:$0xff] (!%p230_p10)  ;;  %vm387_vm2 = vcmask (!%p230_p10), 523264  }
  0x11   : > { %663 = vmatpush3.bf16.msra.mxu0 (!%p230_p10), %v662_v4  ;;  %s935_s11 = scalar_lea.vmem (!%p230_p10), [#allocation2], %s607_s27  ;;  %v671_v13 = vpack.c.bf16 (!%p230_p10), %v382_v11, %v381_v10  ;;  %v384_v15 = vld [vmem:[%s1024_s3 + $0x28] sm:$0xff] (!%p230_p10)  ;;  %v385_v18 = vld [vmem:[%s1024_s3 + $0x30] sm:$0xff] (!%p230_p10)  ;;  %v386_v19 = vld [vmem:[%s1024_s3 + $0x38] sm:$0xff] (!%p230_p10)  ;;  %s614_s16 = sshll.u32 (!%p230_p10), %s807_s21, 7 }
  0x12   : > { %664 = vmatprep.subr.bf16.mxu0 (!%p230_p10), %v817_v3  ;;  %290 = vst.msk [vmem:[%s935_s11] sm:$0xff] (!%p230_p10), %vm289_vm1, %v819_v6  ;;  %669 = vmatpush3.bf16.msra.mxu1 (!%p230_p10), %v668_v9  ;;  %v674_v17 = vpack.c.bf16 (!%p230_p10), %v384_v15, %v383_v14  ;;  %v677_v20 = vpack.c.bf16 (!%p230_p10), %v386_v19, %v385_v18  ;;  %v609_v21 = vld [vmem:[%s1023_s2] ss:$0 sm:$0xff] (!%p230_p10)  ;;  %s477_s29 = scalar_lea.sflag (!%p230_p10), [#allocation3], %s265_s15 }
  0x13   : > { %670 = vmatprep.subr.bf16.mxu1 (!%p230_p10), %v817_v3  ;;  %v612_v30 = vld [vmem:[%s1025_s4] ss:$0 sm:$0xff] (!%p230_p10) }
  0x15   : > { %666 = vmatpush3.bf16.msra.mxu0 (!%p230_p10), %v665_v12 }
  0x16   : > { %s269_s10 = scalar_select %p268_p11, %s807_s21, 1  ;;  %672 = vmatpush3.bf16.msra.mxu1 %v671_v13 }
  0x17   : > { %673 = vmatprep.subr.bf16.mxu1 %v817_v3  ;;  %s820_s21 = smov [#allocation2]  }
  0x18   : > { %s608_s17 = sshll.u32 %s269_s10, 3  ;;  %s741_s8 = sshll.u32 %s820_s21, 4  ;;  %s742_s8 = int_to_ptr.vmem [resolvable:$false] %s741_s8 }
  0x19   : > { %s271_s27 = scalar_lea.vmem %s1021_s0, %s608_s17  ;;  %v378_v26 = vld [vmem:[%s935_s11] sm:$0xff]  ;;  %s490_s17 = sshll.u32 %s935_s11, 4  ;;  %s972_s17 = int_to_ptr.vmem [resolvable:$true] %s490_s17 }
  0x1a   : > { %v291_v16 = vld [vmem:[%s271_s27] sm:$0xff]  ;;  %675 = vmatpush3.bf16.msra.mxu1 %v674_v17  ;;  %s970_s27 = scalar_lea.hbm %s1026_s5, %s614_s16  ;;  %s737_s7 = scalar_lea.vmem %s972_s17, 128 }
  0x1b   : > { %640 = vmatmul.mubr.msk.f32.vlgmr.msra.gmra.mrb[0].mxu0 %vm289_vm1, %v291_v16  ;;  %676 = vmatprep.subr.bf16.mxu1 %v817_v3  ;;  %p738_p12 = scmp.ne.s32.totalorder %s972_s17, %s737_s7  ;;  %s743_s9 = scalar_lea.vmem %s742_s8, 256 }
  0x1c   : > { %p744_p1 = scmp.lt.s32.totalorder %s972_s17, %s742_s8  ;;  %p745_p2 = scmp.lt.s32.totalorder %s743_s9, %s737_s7 }
  0x1d   : > { %p739_p13 = pnand %p738_p12, %p891_p4 }
  0x1e   : > { %678 = vmatpush3.bf16.msra.mxu1 %v677_v20  ;;  %p746_p3 = por %p745_p2, %p744_p1 }
  0x1f   : > { %p740_p0 = pneg %p739_p13 }
  0x21   : > { %p747_p5 = pnand %p746_p3, %p740_p0 }
  0xee   : > { %v373_v22 = vpop.f32.mrb[0].mxu0 }
  0xef   : > { %v374_v23 = vadd.f32 %v609_v21, %v373_v22  ;;  %v641_v24 = vpop.f32.mrb[1].mxu0 }
  0xf1   : > { %v377_v25 = vmax.f32 %v374_v23, 0.0 }
  0xf3   : > { %659 = vmatmul.mubr.msk.f32.vlgmr.msra.gmra.mrb[0].mxu1 %vm387_vm2, %v377_v25 }
 0x1c6   : > { %v457_v27 = vpop.f32.mrb[0].mxu1 }
 0x1c7   : > { %v461_v28 = vadd.f32 %v457_v27, %v378_v26  ;;  %v660_v29 = vpop.f32.mrb[1].mxu1 }
 0x1c9   : > { %462 = vst.msk [vmem:[%s935_s11] sm:$0xff] %vm289_vm1, %v461_v28 }
 0x1d0   : > { %v466_v31 = vld [vmem:[%s935_s11] sm:$0xff] }
 0x1d1   : > { %v474_v32 = vadd.f32 %v612_v30, %v466_v31 }
 0x1d3   : > { %475 = vst.msk [vmem:[%s935_s11] sm:$0xff] %vm289_vm1, %v474_v32 }
 0x1d4   : > { %750 = shalt.err (!%p747_p5)
}
 0x1d5   : > { %s751_s15 = scalar_lea.hbm %s970_s27, 128  ;;  %s755_s12 = scalar_lea.hbm %s1026_s5, 256 }
 0x1d6   : > { %p752_p6 = scmp.ne.s32.totalorder %s970_s27, %s751_s15  ;;  %p756_p10 = scmp.lt.u32.totalorder %s970_s27, %s1026_s5 }
 0x1d7   : > { %p757_p11 = scmp.lt.u32.totalorder %s755_s12, %s751_s15  ;;  %p759_p13 = scmp.lt.u32.totalorder %s751_s15, %s970_s27 }
 0x1d8   : > { %p753_p7 = pnand %p752_p6, %p891_p4 }
 0x1d9   : > { %p758_p12 = por %p757_p11, %p756_p10 }
 0x1da   : > { %p754_p9 = pneg %p753_p7 }
 0x1db   : > { %p760_p0 = por %p759_p13, %p758_p12 }
 0x1dd   : > { %p761_p1 = pnand %p760_p0, %p754_p9 }
 0x1df   : > { %764 = shalt.err (!%p761_p1)
}
 0x1e0   : > { %679 = dma.vmem_to_hbm [thread:$0]  (%p891_p4), %s972_s17, 128, %s970_s27, %s477_s29  }
 0x1e1 PF: > { %p685_p2 = scmp.ge.s32.totalorder %s815_s23, 2  ;;  %s502_s16 = sand.u32 1, %s795_s18  }
 0x1e2   : > { %s503_s24 = scalar_lea.sflag [#allocation3], %s502_s16 }
 0x1e3   : > { %p682_p3 = pnand %p685_p2, %p898_p8 }
 0x1e5   : > { %790 = dma.done.wait (!%p682_p3), %s503_s24, 128  }
 0x1e6   : > { %792 = vsyncadd (!%p682_p3), %s503_s24, 4294967168  ;;  %s18_s23 = sadd.s32 1, %s815_s23   ;;  %s1029_s18 = smov %s799_s19 }
 0x1e7   : > { %p15_p5 = scmp.ge.s32.totalorder %s18_s23, 4   ;;  %s1030_s19 = smov %s803_s20 }
 0x1e8   : > { %s1031_s20 = smov %s904_s6  ;;  %s1032_s21 = smov %s811_s22 }
 0x1e9   : > { %s1033_s22 = smov %s1035_s26  ;;  %17 = sbr.rel (!%p15_p5) target bundleno = 4 (0x4), region = 92 }
 0x1f0   :  { %508 = vsyncpa [#allocation3], 1 }
 0x1f1   :  { %510 = vsyncpa [#allocation3 + $0x1], 1 }

</bundles_post_ra>
